<compile_context>
chip_gen: v7x
topology: tpu7x:2x2x1
jax: 0.10.0
libtpu: 0.0.40
codegen_flags: <defaults>
</compile_context>

<pallas_src>
import math
import functools

import jax
import jax.numpy as jnp
from jax.experimental import pallas as pl
from jax.experimental.pallas import tpu as pltpu


# ---------------------------------------------------------------------------
# In-kernel helpers
# ---------------------------------------------------------------------------

def _matmul(x, w_ref):
    """x @ w with x cast to the weight dtype (bf16 or f32); f32 accumulation."""
    w = w_ref[...]
    return jnp.dot(x.astype(w.dtype), w, preferred_element_type=jnp.float32)


def _layernorm(x, g, b, eps=1e-5):
    mu = jnp.mean(x, axis=-1, keepdims=True)
    xc = x - mu
    var = jnp.mean(xc * xc, axis=-1, keepdims=True)
    return xc * jax.lax.rsqrt(var + eps) * g + b


def _unpack_resnet_refs(wrefs, layer_has_res):
    layers, i = [], 0
    for has_res in layer_has_res:
        w, b = wrefs[i], wrefs[i + 1]
        i += 2
        wres = None
        if has_res:
            wres = wrefs[i]
            i += 1
        layers.append((w, b, wres))
    return layers, wrefs[i], wrefs[i + 1]


def _apply_resnet(x, layers, w_out_ref, b_out_ref):
    """ResidualNetwork: fea = LeakyReLU(fc(fea)) + res_fc(fea); final Linear."""
    fea = x
    for (w_ref, b_ref, wres_ref) in layers:
        h = _matmul(fea, w_ref) + b_ref[...]
        h = jnp.where(h >= 0.0, h, 0.01 * h)              # LeakyReLU(0.01)
        if wres_ref is None:
            fea = h + fea                                  # identity skip
        else:
            fea = h + _matmul(fea, wres_ref)               # projection skip
    return _matmul(fea, w_out_ref) + b_out_ref[...]


# ---------------------------------------------------------------------------
# Pallas kernels
# ---------------------------------------------------------------------------

def _input_stage_kernel(*refs, layer_has_res):
    """Fused: input ResidualNetwork -> concat(kmer_emb, inner) -> + positional enc."""
    feat_ref, emb_ref, pe_ref = refs[:3]
    o_ref = refs[-1]
    layers, w_out, b_out = _unpack_resnet_refs(refs[3:-1], layer_has_res)
    inner = _apply_resnet(feat_ref[...], layers, w_out, b_out)       # (M, D - E) f32
    x = jnp.concatenate([emb_ref[...], inner], axis=-1) + pe_ref[...]
    o_ref[...] = x.astype(o_ref.dtype)


def _encoder_layer_kernel(x_ref, mask_ref, wqkv_ref, bqkv_ref, wo_ref, bo_ref,
                          ln1g_ref, ln1b_ref, w1_ref, b1_ref, w2_ref, b2_ref,
                          ln2g_ref, ln2b_ref, o_ref, *, num_heads, scale):
    """One fully fused post-norm TransformerEncoderLayer for one batch element."""
    x = x_ref[...]                                         # (S, D) f32
    S, D = x.shape
    Dh = D // num_heads
    mask = mask_ref[0]                                     # (1, S) additive mask

    # fused QKV projection: one MXU pass over the concatenated (D, 3D) bf16 weight
    qkv = _matmul(x, wqkv_ref) + bqkv_ref[...]             # (S, 3D) f32

    heads = []
    for h in range(num_heads):                             # lane-aligned head slices
        qh = qkv[:, h * Dh:(h + 1) * Dh] * scale
        kh = qkv[:, D + h * Dh:D + (h + 1) * Dh]
        vh = qkv[:, 2 * D + h * Dh:2 * D + (h + 1) * Dh]
        s = jax.lax.dot_general(qh, kh, (((1,), (1,)), ((), ())),
                                preferred_element_type=jnp.float32)  # (S, S)
        s = s + mask
        s = s - jnp.max(s, axis=-1, keepdims=True)
        e = jnp.exp(s)                                     # softmax in f32
        p = e * pl.reciprocal(jnp.sum(e, axis=-1, keepdims=True), approx=True)
        heads.append(jnp.dot(p, vh, preferred_element_type=jnp.float32))
    attn = jnp.concatenate(heads, axis=-1)                 # (S, D)

    a = _matmul(attn, wo_ref) + bo_ref[...]                # output projection
    x = _layernorm(x + a, ln1g_ref[...], ln1b_ref[...])    # post-norm 1 (f32 stats)

    ff = _matmul(x, w1_ref) + b1_ref[...]                  # FFN
    ff = jnp.maximum(ff, 0.0)                              # relu
    ff = _matmul(ff, w2_ref) + b2_ref[...]
    x = _layernorm(x + ff, ln2g_ref[...], ln2b_ref[...])   # post-norm 2

    o_ref[...] = x.astype(o_ref.dtype)


def _output_stage_kernel(*refs, layer_has_res):
    """Fused: output ResidualNetwork -> masked mean pooling (as one tiny matmul)."""
    x_ref, pool_ref = refs[:2]
    o_ref = refs[-1]
    layers, w_out, b_out = _unpack_resnet_refs(refs[2:-1], layer_has_res)
    val = _apply_resnet(x_ref[...], layers, w_out, b_out)            # (B*S, C) f32
    # pool_ref is (B, B*S) with (position < length) / length folded in
    o_ref[...] = jnp.dot(pool_ref[...], val,
                         preferred_element_type=jnp.float32).astype(o_ref.dtype)


# ---------------------------------------------------------------------------
# pallas_call wrappers
# ---------------------------------------------------------------------------

def _full_spec(arr):
    n = arr.ndim
    return pl.BlockSpec(arr.shape, lambda *_: (0,) * n)


def _flatten_resnet_params(p):
    flat, has_res = [], []
    for (w, b, wres) in p["layers"]:
        flat += [w, b]
        if wres is not None:
            flat.append(wres)
        has_res.append(wres is not None)
    w_out, b_out = p["out"]
    flat += [w_out, b_out]
    return flat, tuple(has_res)


def input_stage(features2, emb2, pe2, p_in):
    M = features2.shape[0]
    D = pe2.shape[-1]
    flat, has_res = _flatten_resnet_params(p_in)
    args = [features2, emb2, pe2] + flat
    return pl.pallas_call(
        functools.partial(_input_stage_kernel, layer_has_res=has_res),
        out_shape=jax.ShapeDtypeStruct((M, D), jnp.float32),
        grid=(1,),
        in_specs=[_full_spec(a) for a in args],
        out_specs=pl.BlockSpec((M, D), lambda i: (0, 0)),
    )(*args)


def encoder_layer(x2, mask_add, p, B, S, num_heads):
    D = x2.shape[-1]
    scale = 1.0 / math.sqrt(D // num_heads)
    weights = [p["wqkv"], p["bqkv"], p["wo"], p["bo"],
               p["ln1_g"], p["ln1_b"], p["w1"], p["b1"],
               p["w2"], p["b2"], p["ln2_g"], p["ln2_b"]]
    return pl.pallas_call(
        functools.partial(_encoder_layer_kernel, num_heads=num_heads, scale=scale),
        out_shape=jax.ShapeDtypeStruct((B * S, D), jnp.float32),
        grid=(B,),                                  # batch rows are independent
        in_specs=[pl.BlockSpec((S, D), lambda b: (b, 0)),
                  pl.BlockSpec((1, 1, S), lambda b: (b, 0, 0))]
                 + [_full_spec(w) for w in weights],
        out_specs=pl.BlockSpec((S, D), lambda b: (b, 0)),
        compiler_params=pltpu.CompilerParams(
            dimension_semantics=("parallel",),      # megacore split over batch (v7x)
            vmem_limit_bytes=48 * 1024 * 1024),     # headroom for bf16 weight buffers
    )(x2, mask_add, *weights)


def output_stage(x2, pool_mat, p_out, num_classes):
    B = pool_mat.shape[0]
    flat, has_res = _flatten_resnet_params(p_out)
    args = [x2, pool_mat] + flat
    return pl.pallas_call(
        functools.partial(_output_stage_kernel, layer_has_res=has_res),
        out_shape=jax.ShapeDtypeStruct((B, num_classes), jnp.float32),
        grid=(1,),
        in_specs=[_full_spec(a) for a in args],
        out_specs=pl.BlockSpec((B, num_classes), lambda i: (0, 0)),
    )(*args)


# ---------------------------------------------------------------------------
# Forward pass (plain-JAX glue limited to gather + tiny mask/PE/pool prep)
# ---------------------------------------------------------------------------

def base_mod_encoder_forward(params, lengths, kmers, offsets, features,
                             num_heads=4):
    del offsets                                            # unused in reference forward
    B, S, nf = features.shape

    # kmer embedding lookup (tiny gather; no Pallas win at this scale)
    emb2 = jnp.take(params["kmer_embedding"], kmers.reshape(-1), axis=0)  # (B*S, E)
    # positional encoding broadcast over batch
    pe2 = jnp.tile(params["pe"][:S], (B, 1))                              # (B*S, D)

    # key-padding mask: True where position >= length (padding)
    pad = jnp.arange(S)[None, :] >= lengths[:, None]                      # (B, S)
    mask_add = jnp.where(pad, -1e9, 0.0).astype(jnp.float32)[:, None, :]  # (B, 1, S)

    # masked-mean pooling matrix (B, B*S): block-diagonal keep/length weights
    # NOTE: matches reference semantics; a zero length would give inf, as in PyTorch.
    keep = (~pad).astype(jnp.float32) / lengths.astype(jnp.float32)[:, None]
    pool_mat = (jnp.eye(B, dtype=jnp.float32)[:, :, None] * keep[None, :, :]
                ).reshape(B, B * S)

    # fused input stage: input_nn -> concat(emb, .) -> + PE
    x2 = input_stage(features.reshape(B * S, nf), emb2, pe2, params["input_nn"])

    # fused transformer encoder layers
    for lp in params["encoder_layers"]:
        x2 = encoder_layer(x2, mask_add, lp, B, S, num_heads)

    # fused output stage: output_nn -> masked mean pooling
    num_classes = params["output_nn"]["out"][0].shape[-1]
    out = output_stage(x2, pool_mat, params["output_nn"], num_classes)
    return out, None, {}


# ---------------------------------------------------------------------------
# Deterministic parameter initialization (synthetic; shapes follow __init__)
# ---------------------------------------------------------------------------

class KeyGen:
    def __init__(self, key):
        self._key = key

    def __call__(self):
        self._key, sub = jax.random.split(self._key)
        return sub


def xavier_uniform(key, fan_in, fan_out):
    a = math.sqrt(6.0 / (fan_in + fan_out))
    return jax.random.uniform(key, (fan_in, fan_out), jnp.float32, -a, a)


def init_resnet(kg, input_dim, output_dim, hidden_dims):
    dims = [input_dim] + list(hidden_dims)
    layers = []
    for din, dout in zip(dims[:-1], dims[1:]):
        w = xavier_uniform(kg(), din, dout)
        b = jnp.zeros((1, dout), jnp.float32)
        wres = None if din == dout else xavier_uniform(kg(), din, dout)
        layers.append((w, b, wres))
    w_out = xavier_uniform(kg(), dims[-1], output_dim)
    b_out = jnp.zeros((1, output_dim), jnp.float32)
    return {"layers": layers, "out": (w_out, b_out)}


def sinusoidal_pe(max_len, d_model):
    pos = jnp.arange(max_len, dtype=jnp.float32)[:, None]
    div = jnp.exp(jnp.arange(0, d_model, 2, dtype=jnp.float32)
                  * (-math.log(10000.0) / d_model))
    pe = jnp.zeros((max_len, d_model), jnp.float32)
    pe = pe.at[:, 0::2].set(jnp.sin(pos * div))
    pe = pe.at[:, 1::2].set(jnp.cos(pos * div))
    return pe


def init_encoder_layer(kg, d_model, dim_ff):
    wq = xavier_uniform(kg(), d_model, d_model)
    wk = xavier_uniform(kg(), d_model, d_model)
    wv = xavier_uniform(kg(), d_model, d_model)
    return {
        # transformer weights stored bf16 (HBM-traffic dominant); biases/LN in f32
        "wqkv": jnp.concatenate([wq, wk, wv], axis=1).astype(jnp.bfloat16),
        "bqkv": jnp.zeros((1, 3 * d_model), jnp.float32),
        "wo": xavier_uniform(kg(), d_model, d_model).astype(jnp.bfloat16),
        "bo": jnp.zeros((1, d_model), jnp.float32),
        "w1": xavier_uniform(kg(), d_model, dim_ff).astype(jnp.bfloat16),
        "b1": jnp.zeros((1, dim_ff), jnp.float32),
        "w2": xavier_uniform(kg(), dim_ff, d_model).astype(jnp.bfloat16),
        "b2": jnp.zeros((1, d_model), jnp.float32),
        "ln1_g": jnp.ones((1, d_model), jnp.float32),
        "ln1_b": jnp.zeros((1, d_model), jnp.float32),
        "ln2_g": jnp.ones((1, d_model), jnp.float32),
        "ln2_b": jnp.zeros((1, d_model), jnp.float32),
    }


def init_params(kg, *, max_features, num_features, num_kmers, embedding_dim,
                d_model, num_heads, num_layer, input_nn_dims, output_nn_dims,
                num_classes):
    del num_heads
    return {
        "kmer_embedding": xavier_uniform(kg(), num_kmers + 1, embedding_dim),
        "input_nn": init_resnet(kg, num_features, d_model - embedding_dim,
                                input_nn_dims),
        "pe": sinusoidal_pe(max_features, d_model),
        "encoder_layers": [init_encoder_layer(kg, d_model, d_model * 4)
                           for _ in range(num_layer)],
        "output_nn": init_resnet(kg, d_model, num_classes, output_nn_dims),
    }


# ---------------------------------------------------------------------------
# Main
# ---------------------------------------------------------------------------

if __name__ == "__main__":
    B, S = 2, 8                       # batch, max_features (sequence length)
    NUM_FEATURES = 6
    NUM_KMERS = 4096
    EMB_DIM = 32
    D_MODEL = 512
    NUM_HEADS = 4
    NUM_LAYERS = 3
    INPUT_NN_DIMS = [64, 128, 256]
    OUTPUT_NN_DIMS = [512, 256, 128, 64]
    NUM_CLASSES = 2

    kg = KeyGen(jax.random.PRNGKey(0))
    params = init_params(kg,
                         max_features=S,
                         num_features=NUM_FEATURES,
                         num_kmers=NUM_KMERS,
                         embedding_dim=EMB_DIM,
                         d_model=D_MODEL,
                         num_heads=NUM_HEADS,
                         num_layer=NUM_LAYERS,
                         input_nn_dims=INPUT_NN_DIMS,
                         output_nn_dims=OUTPUT_NN_DIMS,
                         num_classes=NUM_CLASSES)

    lengths = jnp.array([8, 5], dtype=jnp.int32)                              # (B,)
    kmers = jax.random.randint(kg(), (B, S), 0, NUM_KMERS + 1, dtype=jnp.int32)
    offsets = jnp.zeros((B, S), dtype=jnp.int32)                              # unused
    features = jax.random.normal(kg(), (B, S, NUM_FEATURES), dtype=jnp.float32)

    out, attn, extra = base_mod_encoder_forward(params, lengths, kmers, offsets,
                                                features, num_heads=NUM_HEADS)
    out = jax.block_until_ready(out)

    assert out.shape == (B, NUM_CLASSES), out.shape
    assert attn is None and extra == {}
    assert bool(jnp.all(jnp.isfinite(out)))
    print("KERNEL_OK")
</pallas_src>

<mosaic_0001>
module attributes {stable_mosaic.version = 11 : i64} {
  func.func @_input_stage_kernel(%arg0: i32, %arg1: memref<16x6xf32, #tpu.memory_space<vmem>>, %arg2: memref<16x32xf32, #tpu.memory_space<vmem>>, %arg3: memref<16x512xf32, #tpu.memory_space<vmem>>, %arg4: memref<6x64xf32, #tpu.memory_space<vmem>>, %arg5: memref<1x64xf32, #tpu.memory_space<vmem>>, %arg6: memref<6x64xf32, #tpu.memory_space<vmem>>, %arg7: memref<64x128xf32, #tpu.memory_space<vmem>>, %arg8: memref<1x128xf32, #tpu.memory_space<vmem>>, %arg9: memref<64x128xf32, #tpu.memory_space<vmem>>, %arg10: memref<128x256xf32, #tpu.memory_space<vmem>>, %arg11: memref<1x256xf32, #tpu.memory_space<vmem>>, %arg12: memref<128x256xf32, #tpu.memory_space<vmem>>, %arg13: memref<256x480xf32, #tpu.memory_space<vmem>>, %arg14: memref<1x480xf32, #tpu.memory_space<vmem>>, %arg15: memref<16x512xf32, #tpu.memory_space<vmem>>) attributes {dimension_semantics = [#tpu.dimension_semantics<arbitrary>], iteration_bounds = array<i64: 1>, scalar_prefetch = 0 : i64, scratch_operands = 0 : i64, tpu.core_type = #tpu.core_type<tc>, window_params = [{pipeline_mode = #tpu.pipeline_mode<synchronous>, transform_indices = @transform_0, window_bounds = array<i64: 16, 6>}, {pipeline_mode = #tpu.pipeline_mode<synchronous>, transform_indices = @transform_1, window_bounds = array<i64: 16, 32>}, {pipeline_mode = #tpu.pipeline_mode<synchronous>, transform_indices = @transform_2, window_bounds = array<i64: 16, 512>}, {pipeline_mode = #tpu.pipeline_mode<synchronous>, transform_indices = @transform_3, window_bounds = array<i64: 6, 64>}, {pipeline_mode = #tpu.pipeline_mode<synchronous>, transform_indices = @transform_4, window_bounds = array<i64: 1, 64>}, {pipeline_mode = #tpu.pipeline_mode<synchronous>, transform_indices = @transform_5, window_bounds = array<i64: 6, 64>}, {pipeline_mode = #tpu.pipeline_mode<synchronous>, transform_indices = @transform_6, window_bounds = array<i64: 64, 128>}, {pipeline_mode = #tpu.pipeline_mode<synchronous>, transform_indices = @transform_7, window_bounds = array<i64: 1, 128>}, {pipeline_mode = #tpu.pipeline_mode<synchronous>, transform_indices = @transform_8, window_bounds = array<i64: 64, 128>}, {pipeline_mode = #tpu.pipeline_mode<synchronous>, transform_indices = @transform_9, window_bounds = array<i64: 128, 256>}, {pipeline_mode = #tpu.pipeline_mode<synchronous>, transform_indices = @transform_10, window_bounds = array<i64: 1, 256>}, {pipeline_mode = #tpu.pipeline_mode<synchronous>, transform_indices = @transform_11, window_bounds = array<i64: 128, 256>}, {pipeline_mode = #tpu.pipeline_mode<synchronous>, transform_indices = @transform_12, window_bounds = array<i64: 256, 480>}, {pipeline_mode = #tpu.pipeline_mode<synchronous>, transform_indices = @transform_13, window_bounds = array<i64: 1, 480>}, {pipeline_mode = #tpu.pipeline_mode<synchronous>, transform_indices = @transform_14, window_bounds = array<i64: 16, 512>}]} {
    %c0 = arith.constant 0 : index
    %c0_0 = arith.constant 0 : index
    %0 = vector.load %arg1[%c0, %c0_0] : memref<16x6xf32, #tpu.memory_space<vmem>>, vector<16x6xf32>
    %c0_1 = arith.constant 0 : index
    %c0_2 = arith.constant 0 : index
    %1 = vector.load %arg4[%c0_1, %c0_2] : memref<6x64xf32, #tpu.memory_space<vmem>>, vector<6x64xf32>
    %cst = arith.constant dense<0.000000e+00> : vector<16x64xf32>
    %2 = tpu.matmul %0, %1, %cst {dimension_numbers = #tpu.dot_dimension_numbers<[1], [0], [0], [1], [0, 0, 1, 1], [], []>} : vector<16x6xf32>, vector<6x64xf32>, vector<16x64xf32> -> vector<16x64xf32>
    %c0_3 = arith.constant 0 : index
    %c0_4 = arith.constant 0 : index
    %3 = vector.load %arg5[%c0_3, %c0_4] : memref<1x64xf32, #tpu.memory_space<vmem>>, vector<1x64xf32>
    %4 = vector.broadcast %3 : vector<1x64xf32> to vector<16x64xf32>
    %5 = arith.addf %2, %4 : vector<16x64xf32>
    %cst_5 = arith.constant 0.000000e+00 : f32
    %6 = vector.broadcast %cst_5 : f32 to vector<16x64xf32>
    %7 = arith.cmpf oge, %5, %6 : vector<16x64xf32>
    %cst_6 = arith.constant 0.00999999977 : f32
    %8 = vector.broadcast %cst_6 : f32 to vector<16x64xf32>
    %9 = arith.mulf %8, %5 : vector<16x64xf32>
    %10 = arith.select %7, %5, %9 : vector<16x64xi1>, vector<16x64xf32>
    %c0_7 = arith.constant 0 : index
    %c0_8 = arith.constant 0 : index
    %11 = vector.load %arg6[%c0_7, %c0_8] : memref<6x64xf32, #tpu.memory_space<vmem>>, vector<6x64xf32>
    %cst_9 = arith.constant dense<0.000000e+00> : vector<16x64xf32>
    %12 = tpu.matmul %0, %11, %cst_9 {dimension_numbers = #tpu.dot_dimension_numbers<[1], [0], [0], [1], [0, 0, 1, 1], [], []>} : vector<16x6xf32>, vector<6x64xf32>, vector<16x64xf32> -> vector<16x64xf32>
    %13 = arith.addf %10, %12 : vector<16x64xf32>
    %c0_10 = arith.constant 0 : index
    %c0_11 = arith.constant 0 : index
    %14 = vector.load %arg7[%c0_10, %c0_11] : memref<64x128xf32, #tpu.memory_space<vmem>>, vector<64x128xf32>
    %cst_12 = arith.constant dense<0.000000e+00> : vector<16x128xf32>
    %15 = tpu.matmul %13, %14, %cst_12 {dimension_numbers = #tpu.dot_dimension_numbers<[1], [0], [0], [1], [0, 0, 1, 1], [], []>} : vector<16x64xf32>, vector<64x128xf32>, vector<16x128xf32> -> vector<16x128xf32>
    %c0_13 = arith.constant 0 : index
    %c0_14 = arith.constant 0 : index
    %16 = vector.load %arg8[%c0_13, %c0_14] : memref<1x128xf32, #tpu.memory_space<vmem>>, vector<1x128xf32>
    %17 = vector.broadcast %16 : vector<1x128xf32> to vector<16x128xf32>
    %18 = arith.addf %15, %17 : vector<16x128xf32>
    %cst_15 = arith.constant 0.000000e+00 : f32
    %19 = vector.broadcast %cst_15 : f32 to vector<16x128xf32>
    %20 = arith.cmpf oge, %18, %19 : vector<16x128xf32>
    %cst_16 = arith.constant 0.00999999977 : f32
    %21 = vector.broadcast %cst_16 : f32 to vector<16x128xf32>
    %22 = arith.mulf %21, %18 : vector<16x128xf32>
    %23 = arith.select %20, %18, %22 : vector<16x128xi1>, vector<16x128xf32>
    %c0_17 = arith.constant 0 : index
    %c0_18 = arith.constant 0 : index
    %24 = vector.load %arg9[%c0_17, %c0_18] : memref<64x128xf32, #tpu.memory_space<vmem>>, vector<64x128xf32>
    %cst_19 = arith.constant dense<0.000000e+00> : vector<16x128xf32>
    %25 = tpu.matmul %13, %24, %cst_19 {dimension_numbers = #tpu.dot_dimension_numbers<[1], [0], [0], [1], [0, 0, 1, 1], [], []>} : vector<16x64xf32>, vector<64x128xf32>, vector<16x128xf32> -> vector<16x128xf32>
    %26 = arith.addf %23, %25 : vector<16x128xf32>
    %c0_20 = arith.constant 0 : index
    %c0_21 = arith.constant 0 : index
    %27 = vector.load %arg10[%c0_20, %c0_21] : memref<128x256xf32, #tpu.memory_space<vmem>>, vector<128x256xf32>
    %cst_22 = arith.constant dense<0.000000e+00> : vector<16x256xf32>
    %28 = tpu.matmul %26, %27, %cst_22 {dimension_numbers = #tpu.dot_dimension_numbers<[1], [0], [0], [1], [0, 0, 1, 1], [], []>} : vector<16x128xf32>, vector<128x256xf32>, vector<16x256xf32> -> vector<16x256xf32>
    %c0_23 = arith.constant 0 : index
    %c0_24 = arith.constant 0 : index
    %29 = vector.load %arg11[%c0_23, %c0_24] : memref<1x256xf32, #tpu.memory_space<vmem>>, vector<1x256xf32>
    %30 = vector.broadcast %29 : vector<1x256xf32> to vector<16x256xf32>
    %31 = arith.addf %28, %30 : vector<16x256xf32>
    %cst_25 = arith.constant 0.000000e+00 : f32
    %32 = vector.broadcast %cst_25 : f32 to vector<16x256xf32>
    %33 = arith.cmpf oge, %31, %32 : vector<16x256xf32>
    %cst_26 = arith.constant 0.00999999977 : f32
    %34 = vector.broadcast %cst_26 : f32 to vector<16x256xf32>
    %35 = arith.mulf %34, %31 : vector<16x256xf32>
    %36 = arith.select %33, %31, %35 : vector<16x256xi1>, vector<16x256xf32>
    %c0_27 = arith.constant 0 : index
    %c0_28 = arith.constant 0 : index
    %37 = vector.load %arg12[%c0_27, %c0_28] : memref<128x256xf32, #tpu.memory_space<vmem>>, vector<128x256xf32>
    %cst_29 = arith.constant dense<0.000000e+00> : vector<16x256xf32>
    %38 = tpu.matmul %26, %37, %cst_29 {dimension_numbers = #tpu.dot_dimension_numbers<[1], [0], [0], [1], [0, 0, 1, 1], [], []>} : vector<16x128xf32>, vector<128x256xf32>, vector<16x256xf32> -> vector<16x256xf32>
    %39 = arith.addf %36, %38 : vector<16x256xf32>
    %c0_30 = arith.constant 0 : index
    %c0_31 = arith.constant 0 : index
    %40 = vector.load %arg13[%c0_30, %c0_31] : memref<256x480xf32, #tpu.memory_space<vmem>>, vector<256x480xf32>
    %cst_32 = arith.constant dense<0.000000e+00> : vector<16x480xf32>
    %41 = tpu.matmul %39, %40, %cst_32 {dimension_numbers = #tpu.dot_dimension_numbers<[1], [0], [0], [1], [0, 0, 1, 1], [], []>} : vector<16x256xf32>, vector<256x480xf32>, vector<16x480xf32> -> vector<16x480xf32>
    %c0_33 = arith.constant 0 : index
    %c0_34 = arith.constant 0 : index
    %42 = vector.load %arg14[%c0_33, %c0_34] : memref<1x480xf32, #tpu.memory_space<vmem>>, vector<1x480xf32>
    %43 = vector.broadcast %42 : vector<1x480xf32> to vector<16x480xf32>
    %44 = arith.addf %41, %43 : vector<16x480xf32>
    %c0_35 = arith.constant 0 : index
    %c0_36 = arith.constant 0 : index
    %45 = vector.load %arg2[%c0_35, %c0_36] : memref<16x32xf32, #tpu.memory_space<vmem>>, vector<16x32xf32>
    %46 = tpu.concatenate %45, %44 in 1 : vector<16x32xf32>, vector<16x480xf32> -> vector<16x512xf32>
    %c0_37 = arith.constant 0 : index
    %c0_38 = arith.constant 0 : index
    %47 = vector.load %arg3[%c0_37, %c0_38] : memref<16x512xf32, #tpu.memory_space<vmem>>, vector<16x512xf32>
    %48 = arith.addf %46, %47 : vector<16x512xf32>
    %c0_39 = arith.constant 0 : index
    %c0_40 = arith.constant 0 : index
    %49 = vector.load %arg15[%c0_39, %c0_40] : memref<16x512xf32, #tpu.memory_space<vmem>>, vector<16x512xf32>
    tpu.vector_store %arg15[%c0_39, %c0_40], %48 {strides = array<i32>} : memref<16x512xf32, #tpu.memory_space<vmem>>, vector<16x512xf32>,
    return
  }
  func.func @transform_0(%arg0: i32) -> (i32, i32) {
    %c0_i32 = arith.constant 0 : i32
    %c0_i32_0 = arith.constant 0 : i32
    %c0_i32_1 = arith.constant 0 : i32
    return %c0_i32, %c0_i32_0 : i32, i32
  }
  func.func @transform_1(%arg0: i32) -> (i32, i32) {
    %c0_i32 = arith.constant 0 : i32
    %c0_i32_0 = arith.constant 0 : i32
    %c0_i32_1 = arith.constant 0 : i32
    return %c0_i32, %c0_i32_0 : i32, i32
  }
  func.func @transform_2(%arg0: i32) -> (i32, i32) {
    %c0_i32 = arith.constant 0 : i32
    %c0_i32_0 = arith.constant 0 : i32
    %c0_i32_1 = arith.constant 0 : i32
    return %c0_i32, %c0_i32_0 : i32, i32
  }
  func.func @transform_3(%arg0: i32) -> (i32, i32) {
    %c0_i32 = arith.constant 0 : i32
    %c0_i32_0 = arith.constant 0 : i32
    %c0_i32_1 = arith.constant 0 : i32
    return %c0_i32, %c0_i32_0 : i32, i32
  }
  func.func @transform_4(%arg0: i32) -> (i32, i32) {
    %c0_i32 = arith.constant 0 : i32
    %c0_i32_0 = arith.constant 0 : i32
    %c0_i32_1 = arith.constant 0 : i32
    return %c0_i32, %c0_i32_0 : i32, i32
  }
  func.func @transform_5(%arg0: i32) -> (i32, i32) {
    %c0_i32 = arith.constant 0 : i32
    %c0_i32_0 = arith.constant 0 : i32
    %c0_i32_1 = arith.constant 0 : i32
    return %c0_i32, %c0_i32_0 : i32, i32
  }
  func.func @transform_6(%arg0: i32) -> (i32, i32) {
    %c0_i32 = arith.constant 0 : i32
    %c0_i32_0 = arith.constant 0 : i32
    %c0_i32_1 = arith.constant 0 : i32
    return %c0_i32, %c0_i32_0 : i32, i32
  }
  func.func @transform_7(%arg0: i32) -> (i32, i32) {
    %c0_i32 = arith.constant 0 : i32
    %c0_i32_0 = arith.constant 0 : i32
    %c0_i32_1 = arith.constant 0 : i32
    return %c0_i32, %c0_i32_0 : i32, i32
  }
  func.func @transform_8(%arg0: i32) -> (i32, i32) {
    %c0_i32 = arith.constant 0 : i32
    %c0_i32_0 = arith.constant 0 : i32
    %c0_i32_1 = arith.constant 0 : i32
    return %c0_i32, %c0_i32_0 : i32, i32
  }
  func.func @transform_9(%arg0: i32) -> (i32, i32) {
    %c0_i32 = arith.constant 0 : i32
    %c0_i32_0 = arith.constant 0 : i32
    %c0_i32_1 = arith.constant 0 : i32
    return %c0_i32, %c0_i32_0 : i32, i32
  }
  func.func @transform_10(%arg0: i32) -> (i32, i32) {
    %c0_i32 = arith.constant 0 : i32
    %c0_i32_0 = arith.constant 0 : i32
    %c0_i32_1 = arith.constant 0 : i32
    return %c0_i32, %c0_i32_0 : i32, i32
  }
  func.func @transform_11(%arg0: i32) -> (i32, i32) {
    %c0_i32 = arith.constant 0 : i32
    %c0_i32_0 = arith.constant 0 : i32
    %c0_i32_1 = arith.constant 0 : i32
    return %c0_i32, %c0_i32_0 : i32, i32
  }
  func.func @transform_12(%arg0: i32) -> (i32, i32) {
    %c0_i32 = arith.constant 0 : i32
    %c0_i32_0 = arith.constant 0 : i32
    %c0_i32_1 = arith.constant 0 : i32
    return %c0_i32, %c0_i32_0 : i32, i32
  }
  func.func @transform_13(%arg0: i32) -> (i32, i32) {
    %c0_i32 = arith.constant 0 : i32
    %c0_i32_0 = arith.constant 0 : i32
    %c0_i32_1 = arith.constant 0 : i32
    return %c0_i32, %c0_i32_0 : i32, i32
  }
  func.func @transform_14(%arg0: i32) -> (i32, i32) {
    %c0_i32 = arith.constant 0 : i32
    %c0_i32_0 = arith.constant 0 : i32
    %c0_i32_1 = arith.constant 0 : i32
    return %c0_i32, %c0_i32_0 : i32, i32
  }
}

</mosaic_0001>

<bundles_post_ra>
// kernel: tpu_custom_call.1
= control target key start
LH: loop header
LB: loop body
LE: loop exit
PB: predicated region body
PF: predicated region fallthrough
CT: control target
= control target key end

     0   :  { %vm65_vm0 = vcmask 1045504   ;;  %vm58_vm1 = vcmask 48128   ;;  %s2188_s0 = inlined_call_operand.vmem [shape: f32[16,6], index: 0, kind: input, shape index: {}]   ;;  %s2189_s1 = inlined_call_operand.vmem [shape: f32[16,32], index: 1, kind: input, shape index: {}]   ;;  %s2190_s2 = inlined_call_operand.vmem [shape: f32[16,512], index: 2, kind: input, shape index: {}]   ;;  %s2191_s3 = inlined_call_operand.vmem [shape: f32[6,64], index: 3, kind: input, shape index: {}]   ;;  %s2192_s4 = inlined_call_operand.vmem [shape: f32[1,64], index: 4, kind: input, shape index: {}]   ;;  %s2193_s5 = inlined_call_operand.vmem [shape: f32[6,64], index: 5, kind: input, shape index: {}]   ;;  %s2194_s6 = inlined_call_operand.vmem [shape: f32[64,128], index: 6, kind: input, shape index: {}]   ;;  %s2195_s7 = inlined_call_operand.vmem [shape: f32[1,128], index: 7, kind: input, shape index: {}]   ;;  %s2196_s8 = inlined_call_operand.vmem [shape: f32[64,128], index: 8, kind: input, shape index: {}]   ;;  %s2197_s9 = inlined_call_operand.vmem [shape: f32[128,256], index: 9, kind: input, shape index: {}]   ;;  %s2198_s10 = inlined_call_operand.vmem [shape: f32[1,256], index: 10, kind: input, shape index: {}]   ;;  %s2199_s11 = inlined_call_operand.vmem [shape: f32[128,256], index: 11, kind: input, shape index: {}]   ;;  %s2200_s12 = inlined_call_operand.vmem [shape: f32[256,480], index: 12, kind: input, shape index: {}]   ;;  %s2201_s13 = inlined_call_operand.vmem [shape: f32[1,480], index: 13, kind: input, shape index: {}]   ;;  %s2202_s14 = inlined_call_operand.hbm [shape: f32[16,512], index: 14, kind: output, shape index: {}]  }
   0x1   :  { %v50_v0 = vld [vmem:[%s2191_s3] sm:$0x3f]  ;;  %v49_v2 = vld [vmem:[%s2188_s0 + $0x8] sm:$0xff]  ;;  %v233_v9 = vld [vmem:[%s2194_s6 + $0x10] sm:$0xff] }
   0x2   :  { %v48_v1 = vld [vmem:[%s2188_s0] sm:$0xff]  ;;  %1090 = vmatprep.subr.msk.mxu0 %vm65_vm0, %v50_v0  ;;  %v232_v5 = vld [vmem:[%s2194_s6 + $0x8] sm:$0xff]  ;;  %v234_v11 = vld [vmem:[%s2194_s6 + $0x18] sm:$0xff] }
   0x3   :  { %1092 = vmatprep.mubr.msk.f32.mxu0 %vm58_vm1, %v48_v1  ;;  %v150_v3 = vld [vmem:[%s2193_s5] sm:$0x3f]  ;;  %1091 = vmatpush3.msk.msra.mxu0 %vm65_vm0, %v50_v0  ;;  %v335_v8 = vld [vmem:[%s2196_s8 + $0x8] sm:$0xff]  ;;  %v336_v12 = vld [vmem:[%s2196_s8 + $0x10] sm:$0xff]  ;;  %v1142_v14 = vpack.c.bf16 %v234_v11, %v233_v9 }
   0x4   :  { %v231_v4 = vld [vmem:[%s2194_s6] sm:$0xff]  ;;  %1095 = vmatprep.subr.msk.mxu1 %vm65_vm0, %v150_v3  ;;  %1093 = vmatmul.mubr.msk.f32.vlgmr.msra.gmra.mrb[0].mxu0 %vm58_vm1, %v49_v2  ;;  %v337_v13 = vld [vmem:[%s2196_s8 + $0x18] sm:$0xff] }
   0x5   :  { %v1138_v6 = vpack.c.bf16 %v232_v5, %v231_v4  ;;  %v334_v7 = vld [vmem:[%s2196_s8] sm:$0xff]  ;;  %1096 = vmatpush3.msk.msra.mxu1 %vm65_vm0, %v150_v3  ;;  %1097 = vmatprep.mubr.msk.f32.mxu1 %vm58_vm1, %v48_v1  ;;  %v1158_v15 = vpack.c.bf16 %v337_v13, %v336_v12 }
   0x6   :  { %v1154_v10 = vpack.c.bf16 %v335_v8, %v334_v7 }
   0x7   :  { %1139 = vmatprep.subr.bf16.mxu0 %v1138_v6 }
   0x8   :  { %19 = vsyncpa [#allocation3], 0  ;;  %1098 = vmatmul.mubr.msk.f32.vlgmr.msra.gmra.mrb[0].mxu1 %vm58_vm1, %v49_v2  ;;  %1155 = vmatprep.subr.bf16.mxu1 %v1154_v10  ;;  %v235_v16 = vld [vmem:[%s2194_s6 + $0x20] sm:$0xff]  ;;  %v236_v17 = vld [vmem:[%s2194_s6 + $0x28] sm:$0xff]  ;;  %vm246_vm4 = vcmask 523264   ;;  %s1391_s20 = smov 32  }
   0x9   :  { %1141 = vmatpush3.bf16.msra.mxu0 %v1138_v6  ;;  %1157 = vmatpush3.bf16.msra.mxu1 %v1154_v10  ;;  %v338_v18 = vld [vmem:[%s2196_s8 + $0x20] sm:$0xff]  ;;  %v1146_v19 = vpack.c.bf16 %v236_v17, %v235_v16  ;;  %v339_v20 = vld [vmem:[%s2196_s8 + $0x28] sm:$0xff]  ;;  %v237_v22 = vld [vmem:[%s2194_s6 + $0x30] sm:$0xff]  ;;  %vm995_vm11 = vcmask 261120   ;;  %s1392_s16 = smov [#allocation2]  }
   0xa   :  { %1143 = vmatprep.subr.bf16.mxu0 %v1142_v14  ;;  %1159 = vmatprep.subr.bf16.mxu1 %v1158_v15  ;;  %v1162_v21 = vpack.c.bf16 %v339_v20, %v338_v18  ;;  %v238_v23 = vld [vmem:[%s2194_s6 + $0x38] sm:$0xff]  ;;  %v340_v24 = vld [vmem:[%s2196_s8 + $0x30] sm:$0xff]  ;;  %v420_v28 = vld [vmem:[%s2197_s9 + $0x8] sm:$0xff]  ;;  %s1041_s6 = sshll.u32 %s1392_s16, 4  ;;  %s1042_s6 = int_to_ptr.vmem [resolvable:$true] %s1041_s6 }
   0xb   :  { %v1150_v25 = vpack.c.bf16 %v238_v23, %v237_v22  ;;  %v341_v26 = vld [vmem:[%s2196_s8 + $0x38] sm:$0xff]  ;;  %v553_v30 = vld [vmem:[%s2199_s11 + $0x8] sm:$0xff]  ;;  %v1052_v34 = vld [vmem:[%s2192_s4] ss:$0 sm:$0xff]  ;;  %p1371_p1 = scmp.lt.s32.totalorder %s1042_s6, %s1042_s6 }
   0xc   :  { %v1166_v27 = vpack.c.bf16 %v341_v26, %v340_v24  ;;  %v422_v29 = vld [vmem:[%s2197_s9 + $0x18] sm:$0xff]  ;;  %v419_v42 = vld [vmem:[%s2197_s9] sm:$0xff]  ;;  %v421_v43 = vld [vmem:[%s2197_s9 + $0x10] sm:$0xff] }
   0xd   :  { %1145 = vmatpush3.bf16.msra.mxu0 %v1142_v14  ;;  %1161 = vmatpush3.bf16.msra.mxu1 %v1158_v15  ;;  %v1170_v31 = vpack.c.bf16 %v422_v29, %v420_v28  ;;  %v555_v32 = vld [vmem:[%s2199_s11 + $0x18] sm:$0xff]  ;;  %v552_v45 = vld [vmem:[%s2199_s11] sm:$0xff]  ;;  %v554_v46 = vld [vmem:[%s2199_s11 + $0x10] sm:$0xff]  ;;  %v1172_v55 = vpack.c.bf16 %v421_v43, %v419_v42 }
   0xe   :  { %1147 = vmatprep.subr.bf16.mxu0 %v1146_v19  ;;  %1163 = vmatprep.subr.bf16.mxu1 %v1162_v21  ;;  %v1202_v33 = vpack.c.bf16 %v555_v32, %v553_v30  ;;  %v424_v47 = vld [vmem:[%s2197_s9 + $0x28] sm:$0xff]  ;;  %v426_v49 = vld [vmem:[%s2197_s9 + $0x38] sm:$0xff]  ;;  %v1204_v56 = vpack.c.bf16 %v554_v46, %v552_v45  ;;  %v423_v57 = vld [vmem:[%s2197_s9 + $0x20] sm:$0xff] }
   0xf   :  { %v557_v50 = vld [vmem:[%s2199_s11 + $0x28] sm:$0xff]  ;;  %v559_v51 = vld [vmem:[%s2199_s11 + $0x38] sm:$0xff]  ;;  %v425_v58 = vld [vmem:[%s2197_s9 + $0x30] sm:$0xff]  ;;  %v1174_v59 = vpack.c.bf16 %v426_v49, %v424_v47 }
  0x10   :  { %v1206_v60 = vpack.c.bf16 %v559_v51, %v557_v50  ;;  %v556_v61 = vld [vmem:[%s2199_s11 + $0x20] sm:$0xff]  ;;  %v558_v62 = vld [vmem:[%s2199_s11 + $0x30] sm:$0xff]  ;;  %v428_v63 = vld [vmem:[%s2197_s9 + $0x48] sm:$0xff]  ;;  %v1176_v3 = vpack.c.bf16 %v425_v58, %v423_v57 }
  0x11   :  { %1149 = vmatpush3.bf16.msra.mxu0 %v1146_v19  ;;  %1165 = vmatpush3.bf16.msra.mxu1 %v1162_v21  ;;  %v430_v0 = vld [vmem:[%s2197_s9 + $0x58] sm:$0xff]  ;;  %v561_v1 = vld [vmem:[%s2199_s11 + $0x48] sm:$0xff]  ;;  %v1208_v4 = vpack.c.bf16 %v558_v62, %v556_v61  ;;  %v427_v5 = vld [vmem:[%s2197_s9 + $0x40] sm:$0xff] }
  0x12   :  { %1151 = vmatprep.subr.bf16.mxu0 %v1150_v25  ;;  %1167 = vmatprep.subr.bf16.mxu1 %v1166_v27  ;;  %v563_v2 = vld [vmem:[%s2199_s11 + $0x58] sm:$0xff]  ;;  %v429_v6 = vld [vmem:[%s2197_s9 + $0x50] sm:$0xff]  ;;  %v1178_v7 = vpack.c.bf16 %v430_v0, %v428_v63  ;;  %v560_v9 = vld [vmem:[%s2199_s11 + $0x40] sm:$0xff] }
  0x13   :  { %v1210_v8 = vpack.c.bf16 %v563_v2, %v561_v1  ;;  %v562_v10 = vld [vmem:[%s2199_s11 + $0x50] sm:$0xff]  ;;  %v432_v11 = vld [vmem:[%s2197_s9 + $0x68] sm:$0xff]  ;;  %v434_v12 = vld [vmem:[%s2197_s9 + $0x78] sm:$0xff]  ;;  %v1180_v15 = vpack.c.bf16 %v429_v6, %v427_v5 }
  0x14   :  { %v565_v13 = vld [vmem:[%s2199_s11 + $0x68] sm:$0xff]  ;;  %v567_v14 = vld [vmem:[%s2199_s11 + $0x78] sm:$0xff]  ;;  %v1212_v16 = vpack.c.bf16 %v562_v10, %v560_v9  ;;  %v431_v17 = vld [vmem:[%s2197_s9 + $0x60] sm:$0xff]  ;;  %v1182_v19 = vpack.c.bf16 %v434_v12, %v432_v11  ;;  %v1390_v9 = vmov 0.0  }
  0x15   :  { %1153 = vmatpush3.bf16.msra.mxu0 %v1150_v25  ;;  %1169 = vmatpush3.bf16.msra.mxu1 %v1166_v27  ;;  %v433_v18 = vld [vmem:[%s2197_s9 + $0x70] sm:$0xff]  ;;  %v1214_v20 = vpack.c.bf16 %v567_v14, %v565_v13  ;;  %v564_v21 = vld [vmem:[%s2199_s11 + $0x60] sm:$0xff]  ;;  %v436_v23 = vld [vmem:[%s2197_s9 + $0x88] sm:$0xff] }
  0x16   :  { %1171 = vmatprep.subr.bf16.mxu0 %v1170_v31  ;;  %1203 = vmatprep.subr.bf16.mxu1 %v1202_v33  ;;  %v566_v22 = vld [vmem:[%s2199_s11 + $0x70] sm:$0xff]  ;;  %v438_v24 = vld [vmem:[%s2197_s9 + $0x98] sm:$0xff]  ;;  %v569_v25 = vld [vmem:[%s2199_s11 + $0x88] sm:$0xff]  ;;  %v1184_v27 = vpack.c.bf16 %v433_v18, %v431_v17 }
  0x17   :  { %v571_v26 = vld [vmem:[%s2199_s11 + $0x98] sm:$0xff]  ;;  %v1216_v28 = vpack.c.bf16 %v566_v22, %v564_v21  ;;  %v435_v29 = vld [vmem:[%s2197_s9 + $0x80] sm:$0xff]  ;;  %v437_v30 = vld [vmem:[%s2197_s9 + $0x90] sm:$0xff]  ;;  %v1186_v31 = vpack.c.bf16 %v438_v24, %v436_v23 }
  0x18   :  { %v1218_v32 = vpack.c.bf16 %v571_v26, %v569_v25  ;;  %v568_v33 = vld [vmem:[%s2199_s11 + $0x80] sm:$0xff]  ;;  %v574_v46 = vld [vmem:[%s2199_s11 + $0xb0] sm:$0xff]  ;;  %v444_v49 = vld [vmem:[%s2197_s9 + $0xc8] sm:$0xff] }
  0x19   :  { %v572_v45 = vld [vmem:[%s2199_s11 + $0xa0] sm:$0xff]  ;;  %v446_v50 = vld [vmem:[%s2197_s9 + $0xd8] sm:$0xff]  ;;  %v577_v51 = vld [vmem:[%s2199_s11 + $0xc8] sm:$0xff] }
  0x1a   :  { %v576_v58 = vld [vmem:[%s2199_s11 + $0xc0] sm:$0xff]  ;;  %v448_v61 = vld [vmem:[%s2197_s9 + $0xe8] sm:$0xff]  ;;  %v450_v62 = vld [vmem:[%s2197_s9 + $0xf8] sm:$0xff] }
  0x1b   :  { %v581_v63 = vld [vmem:[%s2199_s11 + $0xe8] sm:$0xff]  ;;  %v1198_v0 = vpack.c.bf16 %v450_v62, %v448_v61  ;;  %v583_v1 = vld [vmem:[%s2199_s11 + $0xf8] sm:$0xff]  ;;  %v447_v2 = vld [vmem:[%s2197_s9 + $0xe0] sm:$0xff] }
  0x1c   :  { %v580_v6 = vld [vmem:[%s2199_s11 + $0xe0] sm:$0xff]  ;;  %v666_v10 = vld [vmem:[%s2200_s12 + $0x8] sm:$0xff]  ;;  %v668_v12 = vld [vmem:[%s2200_s12 + $0x18] sm:$0xff] }
  0x1d   :  { %v670_v11 = vld [vmem:[%s2200_s12 + $0x28] sm:$0xff]  ;;  %v672_v14 = vld [vmem:[%s2200_s12 + $0x38] sm:$0xff]  ;;  %v665_v24 = vld [vmem:[%s2200_s12] sm:$0xff] }
  0x1e   :  { %v1234_v13 = vpack.c.bf16 %v670_v11, %v666_v10  ;;  %v669_v25 = vld [vmem:[%s2200_s12 + $0x20] sm:$0xff] }
  0x1f   :  { %v697_v11 = vld [vmem:[%s2200_s12 + $0x100] sm:$0xff] }
  0xd7   :  { %v1094_v35 = vpop.f32.mrb[0].mxu0 }
  0xd8   :  { %v141_v36 = vadd.f32 %v1094_v35, %v1052_v34  ;;  %v135_v37 = vpop.f32.mrb[1].mxu0  ;;  %v440_v35 = vld [vmem:[%s2197_s9 + $0xa8] sm:$0xff] }
  0xd9   :  { %v136_v38 = vadd.f32 %v1052_v34, %v135_v37  ;;  %v570_v34 = vld [vmem:[%s2199_s11 + $0x90] sm:$0xff]  ;;  %v573_v37 = vld [vmem:[%s2199_s11 + $0xa8] sm:$0xff] }
  0xda   :  { %v147_v40 = vmul.f32 0.01, %v141_v36  ;;  %vm145_vm2 = vcmp.ge.f32.partialorder %v141_v36, 0.0 }
  0xdb   :  { %v1099_v39 = vpop.f32.mrb[0].mxu1  ;;  %v146_v44 = vmul.f32 0.01, %v136_v38  ;;  %vm144_vm3 = vcmp.ge.f32.partialorder %v136_v38, 0.0 }
  0xdc   :  { %v220_v41 = vpop.f32.mrb[1].mxu1  ;;  %v149_v48 = vsel %vm145_vm2, %v141_v36, %v147_v40  ;;  %v442_v36 = vld [vmem:[%s2197_s9 + $0xb8] sm:$0xff]  ;;  %v1220_v40 = vpack.c.bf16 %v570_v34, %v568_v33 }
  0xdd   :  { %v230_v52 = vadd.f32 %v1099_v39, %v149_v48  ;;  %v148_v53 = vsel %vm144_vm3, %v136_v38, %v146_v44  ;;  %v575_v38 = vld [vmem:[%s2199_s11 + $0xb8] sm:$0xff]  ;;  %v1188_v39 = vpack.c.bf16 %v437_v30, %v435_v29  ;;  %v1190_v42 = vpack.c.bf16 %v442_v36, %v440_v35  ;;  %v441_v44 = vld [vmem:[%s2197_s9 + $0xb0] sm:$0xff]  ;;  %v674_v29 = vld [vmem:[%s2200_s12 + $0x48] sm:$0xff] }
  0xde   :  { %v229_v54 = vadd.f32 %v220_v41, %v148_v53  ;;  %v439_v41 = vld [vmem:[%s2197_s9 + $0xa0] sm:$0xff]  ;;  %v1222_v43 = vpack.c.bf16 %v575_v38, %v573_v37  ;;  %v1224_v48 = vpack.c.bf16 %v574_v46, %v572_v45  ;;  %v579_v53 = vld [vmem:[%s2199_s11 + $0xd8] sm:$0xff]  ;;  %v1236_v37 = vpack.c.bf16 %v669_v25, %v665_v24  ;;  %v682_v45 = vld [vmem:[%s2200_s12 + $0x88] sm:$0xff] }
  0xdf   :  { %v1192_v47 = vpack.c.bf16 %v441_v44, %v439_v41  ;;  %v680_v33 = vld [vmem:[%s2200_s12 + $0x78] sm:$0xff]  ;;  %v679_v44 = vld [vmem:[%s2200_s12 + $0x70] sm:$0xff]  ;;  %v686_v46 = vld [vmem:[%s2200_s12 + $0xa8] sm:$0xff] }
  0xe0   :  { %1116 = vmatprep.mubr.msk.f32.mxu0 %vm246_vm4, %v229_v54  ;;  %1135 = vmatprep.mubr.msk.f32.mxu1 %vm246_vm4, %v229_v54  ;;  %v443_v54 = vld [vmem:[%s2197_s9 + $0xc0] sm:$0xff] }
  0xe1   :  { %1117 = vmatmul.mubr.msk.f32.vlgmr.msra.gmra.mrb[2].mxu0 %vm246_vm4, %v230_v52  ;;  %1136 = vmatmul.mubr.msk.f32.vlgmr.msra.gmra.mrb[2].mxu1 %vm246_vm4, %v230_v52  ;;  %v1194_v52 = vpack.c.bf16 %v446_v50, %v444_v49  ;;  %v709_v24 = vld [vmem:[%s2200_s12 + $0x160] sm:$0xff] }
  0xe2   :  { %1173 = vmatpush1.bf16.msra.mxu0 %v1172_v55  ;;  %1205 = vmatpush1.bf16.msra.mxu1 %v1204_v56  ;;  %v445_v55 = vld [vmem:[%s2197_s9 + $0xd0] sm:$0xff]  ;;  %v1226_v56 = vpack.c.bf16 %v579_v53, %v577_v51  ;;  %v681_v51 = vld [vmem:[%s2200_s12 + $0x80] sm:$0xff]  ;;  %v1242_v53 = vpack.c.bf16 %v686_v46, %v682_v45 }
  0xe3   :  { %1175 = vmatprep.subr.bf16.mxu0 %v1174_v59  ;;  %1207 = vmatprep.subr.bf16.mxu1 %v1206_v60  ;;  %v1196_v57 = vpack.c.bf16 %v445_v55, %v443_v54  ;;  %v578_v59 = vld [vmem:[%s2199_s11 + $0xd0] sm:$0xff] }
  0xe4   :  { %v1228_v60 = vpack.c.bf16 %v578_v59, %v576_v58  ;;  %527 = vmatprep.mubr.f32.mxu0 %v1390_v9  ;;  %648 = vmatprep.mubr.f32.mxu1 %v1390_v9  ;;  %v683_v55 = vld [vmem:[%s2200_s12 + $0x90] sm:$0xff]  ;;  %v694_v58 = vld [vmem:[%s2200_s12 + $0xe8] sm:$0xff]  ;;  %v692_v59 = vld [vmem:[%s2200_s12 + $0xd8] sm:$0xff] }
  0xe6   :  { %1177 = vmatpush1.bf16.msra.mxu0 %v1176_v3  ;;  %1209 = vmatpush1.bf16.msra.mxu1 %v1208_v4  ;;  %v449_v3 = vld [vmem:[%s2197_s9 + $0xf0] sm:$0xff]  ;;  %v1230_v4 = vpack.c.bf16 %v583_v1, %v581_v63  ;;  %v689_v63 = vld [vmem:[%s2200_s12 + $0xc0] sm:$0xff] }
  0xe7   :  { %1179 = vmatprep.subr.bf16.mxu0 %v1178_v7  ;;  %1211 = vmatprep.subr.bf16.mxu1 %v1210_v8  ;;  %v1200_v5 = vpack.c.bf16 %v449_v3, %v447_v2  ;;  %v582_v7 = vld [vmem:[%s2199_s11 + $0xf0] sm:$0xff]  ;;  %s1366_s11 = scalar_lea.vmem %s1042_s6, 1024 }
  0xe8   :  { %v1232_v8 = vpack.c.bf16 %v582_v7, %v580_v6  ;;  %v691_v3 = vld [vmem:[%s2200_s12 + $0xd0] sm:$0xff]  ;;  %v702_v6 = vld [vmem:[%s2200_s12 + $0x128] sm:$0xff]  ;;  %v700_v7 = vld [vmem:[%s2200_s12 + $0x118] sm:$0xff]  ;;  %p1367_p0 = scmp.ne.s32.totalorder %s1042_s6, %s1366_s11  ;;  %p1372_p2 = scmp.lt.s32.totalorder %s1366_s11, %s1366_s11 }
  0xea   :  { %1181 = vmatpush1.bf16.msra.mxu0 %v1180_v15  ;;  %1213 = vmatpush1.bf16.msra.mxu1 %v1212_v16  ;;  %v1298_v15 = vpack.c.bf16 %v672_v14, %v668_v12  ;;  %v1059_v16 = vld [vmem:[%s2195_s7] ss:$0 sm:$0xff]  ;;  %p1373_p3 = por %p1372_p2, %p1371_p1 }
  0xeb   :  { %1183 = vmatprep.subr.bf16.mxu0 %v1182_v19  ;;  %1215 = vmatprep.subr.bf16.mxu1 %v1214_v20  ;;  %v701_v12 = vld [vmem:[%s2200_s12 + $0x120] sm:$0xff] }
  0xec   :  { %p1374_p4 = pnand %p1373_p3, %p1367_p0 }
  0xee   :  { %1185 = vmatpush1.bf16.msra.mxu0 %v1184_v27  ;;  %1217 = vmatpush1.bf16.msra.mxu1 %v1216_v28  ;;  %v667_v27 = vld [vmem:[%s2200_s12 + $0x10] sm:$0xff] }
  0xef   :  { %1187 = vmatprep.subr.bf16.mxu0 %v1186_v31  ;;  %1219 = vmatprep.subr.bf16.mxu1 %v1218_v32  ;;  %v671_v28 = vld [vmem:[%s2200_s12 + $0x30] sm:$0xff]  ;;  %v678_v31 = vld [vmem:[%s2200_s12 + $0x68] sm:$0xff]  ;;  %v676_v32 = vld [vmem:[%s2200_s12 + $0x58] sm:$0xff] }
  0xf0   :  { %v1300_v38 = vpack.c.bf16 %v671_v28, %v667_v27  ;;  %v1238_v41 = vpack.c.bf16 %v678_v31, %v674_v29  ;;  %v707_v27 = vld [vmem:[%s2200_s12 + $0x150] sm:$0xff]  ;;  %v714_v29 = vld [vmem:[%s2200_s12 + $0x188] sm:$0xff]  ;;  %v716_v31 = vld [vmem:[%s2200_s12 + $0x198] sm:$0xff] }
  0xf1   :  { %v711_v28 = vld [vmem:[%s2200_s12 + $0x170] sm:$0xff] }
  0xf2   :  { %1189 = vmatpush1.bf16.msra.mxu0 %v1188_v39  ;;  %1221 = vmatpush1.bf16.msra.mxu1 %v1220_v40  ;;  %v673_v39 = vld [vmem:[%s2200_s12 + $0x40] sm:$0xff] }
  0xf3   :  { %1191 = vmatprep.subr.bf16.mxu0 %v1190_v42  ;;  %1223 = vmatprep.subr.bf16.mxu1 %v1222_v43  ;;  %v677_v40 = vld [vmem:[%s2200_s12 + $0x60] sm:$0xff]  ;;  %v1302_v42 = vpack.c.bf16 %v680_v33, %v676_v32  ;;  %v675_v43 = vld [vmem:[%s2200_s12 + $0x50] sm:$0xff]  ;;  %v720_v32 = vld [vmem:[%s2200_s12 + $0x1b8] sm:$0xff] }
  0xf4   :  { %v1240_v49 = vpack.c.bf16 %v677_v40, %v673_v39  ;;  %v1304_v50 = vpack.c.bf16 %v679_v44, %v675_v43  ;;  %v715_v39 = vld [vmem:[%s2200_s12 + $0x190] sm:$0xff]  ;;  %v724_v43 = vld [vmem:[%s2200_s12 + $0x1d8] sm:$0xff] }
  0xf5   :  { %v719_v40 = vld [vmem:[%s2200_s12 + $0x1b0] sm:$0xff]  ;;  %v728_v44 = vld [vmem:[%s2200_s12 + $0x1f8] sm:$0xff] }
  0xf6   :  { %1193 = vmatpush1.bf16.msra.mxu0 %v1192_v47  ;;  %1225 = vmatpush1.bf16.msra.mxu1 %v1224_v48  ;;  %v684_v47 = vld [vmem:[%s2200_s12 + $0x98] sm:$0xff]  ;;  %v1324_v46 = vpack.c.bf16 %v719_v40, %v715_v39 }
  0xf7   :  { %1195 = vmatprep.subr.bf16.mxu0 %v1194_v52  ;;  %1227 = vmatprep.subr.bf16.mxu1 %v1226_v56  ;;  %v688_v48 = vld [vmem:[%s2200_s12 + $0xb8] sm:$0xff]  ;;  %v685_v52 = vld [vmem:[%s2200_s12 + $0xa0] sm:$0xff]  ;;  %v687_v56 = vld [vmem:[%s2200_s12 + $0xb0] sm:$0xff] }
  0xf8   :  { %v1306_v54 = vpack.c.bf16 %v688_v48, %v684_v47  ;;  %v1244_v61 = vpack.c.bf16 %v685_v52, %v681_v51  ;;  %v1308_v62 = vpack.c.bf16 %v687_v56, %v683_v55  ;;  %v721_v47 = vld [vmem:[%s2200_s12 + $0x1c0] sm:$0xff]  ;;  %v723_v51 = vld [vmem:[%s2200_s12 + $0x1d0] sm:$0xff]  ;;  %v732_v55 = vld [vmem:[%s2200_s12 + $0x218] sm:$0xff] }
  0xf9   :  { %v725_v48 = vld [vmem:[%s2200_s12 + $0x1e0] sm:$0xff]  ;;  %v727_v52 = vld [vmem:[%s2200_s12 + $0x1f0] sm:$0xff]  ;;  %v736_v56 = vld [vmem:[%s2200_s12 + $0x238] sm:$0xff] }
  0xfa   :  { %1197 = vmatpush1.bf16.msra.mxu0 %v1196_v57  ;;  %1229 = vmatpush1.bf16.msra.mxu1 %v1228_v60  ;;  %v690_v57 = vld [vmem:[%s2200_s12 + $0xc8] sm:$0xff]  ;;  %v696_v60 = vld [vmem:[%s2200_s12 + $0xf8] sm:$0xff] }
  0xfb   :  { %1199 = vmatprep.subr.bf16.mxu0 %v1198_v0  ;;  %1231 = vmatprep.subr.bf16.mxu1 %v1230_v4  ;;  %v693_v0 = vld [vmem:[%s2200_s12 + $0xe0] sm:$0xff]  ;;  %v1246_v1 = vpack.c.bf16 %v694_v58, %v690_v57  ;;  %v1310_v2 = vpack.c.bf16 %v696_v60, %v692_v59  ;;  %v695_v4 = vld [vmem:[%s2200_s12 + $0xf0] sm:$0xff]  ;;  %v1264_v57 = vpack.c.bf16 %v725_v48, %v721_v47  ;;  %v764_v39 = vld [vmem:[%s2200_s12 + $0x318] sm:$0xff] }
  0xfc   :  { %v1312_v10 = vpack.c.bf16 %v695_v4, %v691_v3  ;;  %v1328_v58 = vpack.c.bf16 %v727_v52, %v723_v51  ;;  %v729_v59 = vld [vmem:[%s2200_s12 + $0x200] sm:$0xff]  ;;  %v740_v3 = vld [vmem:[%s2200_s12 + $0x258] sm:$0xff]  ;;  %v763_v47 = vld [vmem:[%s2200_s12 + $0x310] sm:$0xff] }
  0xfd   :  { %v733_v60 = vld [vmem:[%s2200_s12 + $0x220] sm:$0xff]  ;;  %v744_v4 = vld [vmem:[%s2200_s12 + $0x278] sm:$0xff]  ;;  %v767_v48 = vld [vmem:[%s2200_s12 + $0x330] sm:$0xff] }
  0xfe   :  { %1201 = vmatpush1.bf16.msra.mxu0 %v1200_v5  ;;  %1233 = vmatpush1.bf16.msra.mxu1 %v1232_v8  ;;  %v698_v5 = vld [vmem:[%s2200_s12 + $0x108] sm:$0xff]  ;;  %v704_v8 = vld [vmem:[%s2200_s12 + $0x138] sm:$0xff] }
  0xff   :  { %1235 = vmatprep.subr.bf16.mxu0 %v1234_v13  ;;  %1299 = vmatprep.subr.bf16.mxu1 %v1298_v15  ;;  %v1250_v13 = vpack.c.bf16 %v702_v6, %v698_v5  ;;  %v1314_v14 = vpack.c.bf16 %v704_v8, %v700_v7  ;;  %v699_v15 = vld [vmem:[%s2200_s12 + $0x110] sm:$0xff]  ;;  %v1268_v5 = vpack.c.bf16 %v733_v60, %v729_v59  ;;  %v737_v7 = vld [vmem:[%s2200_s12 + $0x240] sm:$0xff]  ;;  %v768_v40 = vld [vmem:[%s2200_s12 + $0x338] sm:$0xff] }
 0x100   :  { %v741_v8 = vld [vmem:[%s2200_s12 + $0x260] sm:$0xff]  ;;  %v772_v51 = vld [vmem:[%s2200_s12 + $0x358] sm:$0xff]  ;;  %v771_v59 = vld [vmem:[%s2200_s12 + $0x350] sm:$0xff] }
 0x101   :  { %v776_v52 = vld [vmem:[%s2200_s12 + $0x378] sm:$0xff]  ;;  %v775_v60 = vld [vmem:[%s2200_s12 + $0x370] sm:$0xff] }
 0x1b4   :  { %v1118_v17 = vpop.f32.mrb[2].mxu0  ;;  %v1137_v18 = vpop.f32.mrb[2].mxu1 }
 0x1b5   :  { %v325_v19 = vadd.f32 %v1118_v17, %v1059_v16  ;;  %v319_v20 = vpop.f32.mrb[3].mxu0  ;;  %v408_v21 = vpop.f32.mrb[3].mxu1  ;;  %v706_v17 = vld [vmem:[%s2200_s12 + $0x148] sm:$0xff] }
 0x1b6   :  { %v320_v22 = vadd.f32 %v1059_v16, %v319_v20  ;;  %v703_v16 = vld [vmem:[%s2200_s12 + $0x130] sm:$0xff]  ;;  %v712_v20 = vld [vmem:[%s2200_s12 + $0x178] sm:$0xff] }
 0x1b7   :  { %v331_v23 = vmul.f32 0.01, %v325_v19  ;;  %vm329_vm5 = vcmp.ge.f32.partialorder %v325_v19, 0.0 }
 0x1b8   :  { %v330_v26 = vmul.f32 0.01, %v320_v22  ;;  %vm328_vm6 = vcmp.ge.f32.partialorder %v320_v22, 0.0 }
 0x1b9   :  { %v333_v30 = vsel %vm329_vm5, %v325_v19, %v331_v23  ;;  %v708_v19 = vld [vmem:[%s2200_s12 + $0x158] sm:$0xff]  ;;  %v705_v23 = vld [vmem:[%s2200_s12 + $0x140] sm:$0xff] }
 0x1ba   :  { %v418_v34 = vadd.f32 %v1137_v18, %v333_v30  ;;  %v332_v35 = vsel %vm328_vm6, %v320_v22, %v330_v26  ;;  %v710_v18 = vld [vmem:[%s2200_s12 + $0x168] sm:$0xff]  ;;  %v1316_v22 = vpack.c.bf16 %v703_v16, %v699_v15  ;;  %v1318_v26 = vpack.c.bf16 %v712_v20, %v708_v19  ;;  %v748_v15 = vld [vmem:[%s2200_s12 + $0x298] sm:$0xff]  ;;  %v745_v19 = vld [vmem:[%s2200_s12 + $0x280] sm:$0xff] }
 0x1bb   :  { %v417_v36 = vadd.f32 %v408_v21, %v332_v35  ;;  %v1252_v21 = vpack.c.bf16 %v701_v12, %v697_v11  ;;  %v1254_v25 = vpack.c.bf16 %v710_v18, %v706_v17  ;;  %v718_v30 = vld [vmem:[%s2200_s12 + $0x1a8] sm:$0xff]  ;;  %v1256_v33 = vpack.c.bf16 %v709_v24, %v705_v23  ;;  %v713_v35 = vld [vmem:[%s2200_s12 + $0x180] sm:$0xff]  ;;  %v739_v11 = vld [vmem:[%s2200_s12 + $0x250] sm:$0xff] }
 0x1bc   :  { %v743_v12 = vld [vmem:[%s2200_s12 + $0x270] sm:$0xff]  ;;  %v752_v16 = vld [vmem:[%s2200_s12 + $0x2b8] sm:$0xff]  ;;  %v1272_v17 = vpack.c.bf16 %v741_v8, %v737_v7  ;;  %v749_v20 = vld [vmem:[%s2200_s12 + $0x2a0] sm:$0xff] }
 0x1bd   :  { %528 = vmatmul.mubr.f32.vlgmr.msra.gmra.mrb[4].mxu0 %v417_v36  ;;  %649 = vmatmul.mubr.f32.vlgmr.msra.gmra.mrb[4].mxu1 %v417_v36  ;;  %v717_v36 = vld [vmem:[%s2200_s12 + $0x1a0] sm:$0xff]  ;;  %v1336_v18 = vpack.c.bf16 %v743_v12, %v739_v11  ;;  %v747_v23 = vld [vmem:[%s2200_s12 + $0x290] sm:$0xff]  ;;  %v786_v11 = vld [vmem:[%s2200_s12 + $0x3c8] sm:$0xff] }
 0x1be   :  { %533 = vmatprep.mubr.f32.mxu0 %v1390_v9  ;;  %654 = vmatprep.mubr.f32.mxu1 %v1390_v9  ;;  %v1248_v9 = vpack.c.bf16 %v693_v0, %v689_v63  ;;  %v1260_v45 = vpack.c.bf16 %v717_v36, %v713_v35  ;;  %v731_v63 = vld [vmem:[%s2200_s12 + $0x210] sm:$0xff]  ;;  %v790_v12 = vld [vmem:[%s2200_s12 + $0x3e8] sm:$0xff] }
 0x1bf   :  { %1237 = vmatpush1.bf16.msra.mxu0 %v1236_v37  ;;  %1301 = vmatpush1.bf16.msra.mxu1 %v1300_v38  ;;  %v1258_v37 = vpack.c.bf16 %v718_v30, %v714_v29  ;;  %v1322_v38 = vpack.c.bf16 %v720_v32, %v716_v31  ;;  %v735_v0 = vld [vmem:[%s2200_s12 + $0x230] sm:$0xff]  ;;  %v1276_v29 = vpack.c.bf16 %v749_v20, %v745_v19  ;;  %v753_v31 = vld [vmem:[%s2200_s12 + $0x2c0] sm:$0xff] }
 0x1c0   :  { %1239 = vmatprep.subr.bf16.mxu0 %v1238_v41  ;;  %1303 = vmatprep.subr.bf16.mxu1 %v1302_v42  ;;  %v722_v41 = vld [vmem:[%s2200_s12 + $0x1c8] sm:$0xff]  ;;  %v1332_v6 = vpack.c.bf16 %v735_v0, %v731_v63  ;;  %v751_v24 = vld [vmem:[%s2200_s12 + $0x2b0] sm:$0xff]  ;;  %v757_v32 = vld [vmem:[%s2200_s12 + $0x2e0] sm:$0xff] }
 0x1c1   :  { %534 = vmatmul.mubr.f32.gmra.mrb[6].mxu0 %v418_v34  ;;  %655 = vmatmul.mubr.f32.gmra.mrb[6].mxu1 %v418_v34  ;;  %v1320_v34 = vpack.c.bf16 %v711_v28, %v707_v27  ;;  %v726_v42 = vld [vmem:[%s2200_s12 + $0x1e8] sm:$0xff]  ;;  %v756_v27 = vld [vmem:[%s2200_s12 + $0x2d8] sm:$0xff]  ;;  %v1340_v30 = vpack.c.bf16 %v751_v24, %v747_v23  ;;  %v755_v35 = vld [vmem:[%s2200_s12 + $0x2d0] sm:$0xff]  ;;  %v453_v23 = vlaneseq }
 0x1c2   :  { %v760_v28 = vld [vmem:[%s2200_s12 + $0x2f8] sm:$0xff]  ;;  %v759_v36 = vld [vmem:[%s2200_s12 + $0x2f0] sm:$0xff]  ;;  %v778_v63 = vld [vmem:[%s2200_s12 + $0x388] sm:$0xff] }
 0x1c3   :  { %1241 = vmatpush1.bf16.msra.mxu0 %v1240_v49  ;;  %1305 = vmatpush1.bf16.msra.mxu1 %v1304_v50  ;;  %v1262_v49 = vpack.c.bf16 %v726_v42, %v722_v41  ;;  %v1326_v50 = vpack.c.bf16 %v728_v44, %v724_v43  ;;  %v1280_v41 = vpack.c.bf16 %v757_v32, %v753_v31  ;;  %v761_v43 = vld [vmem:[%s2200_s12 + $0x300] sm:$0xff]  ;;  %v782_v0 = vld [vmem:[%s2200_s12 + $0x3a8] sm:$0xff]  ;;  %v779_v8 = vld [vmem:[%s2200_s12 + $0x390] sm:$0xff]  ;;  %v454_v24 = vshrl.u32 %v453_v23, 7 }
 0x1c4   :  { %1243 = vmatprep.subr.bf16.mxu0 %v1242_v53  ;;  %1307 = vmatprep.subr.bf16.mxu1 %v1306_v54  ;;  %v730_v53 = vld [vmem:[%s2200_s12 + $0x208] sm:$0xff]  ;;  %v1344_v42 = vpack.c.bf16 %v759_v36, %v755_v35  ;;  %v765_v44 = vld [vmem:[%s2200_s12 + $0x320] sm:$0xff]  ;;  %v787_v20 = vld [vmem:[%s2200_s12 + $0x3d0] sm:$0xff] }
 0x1c5   :  { %v734_v54 = vld [vmem:[%s2200_s12 + $0x228] sm:$0xff] }
 0x1c7   :  { %1245 = vmatpush1.bf16.msra.mxu0 %v1244_v61  ;;  %1309 = vmatpush1.bf16.msra.mxu1 %v1308_v62  ;;  %v1266_v61 = vpack.c.bf16 %v734_v54, %v730_v53  ;;  %v1330_v62 = vpack.c.bf16 %v736_v56, %v732_v55  ;;  %v1284_v53 = vpack.c.bf16 %v765_v44, %v761_v43  ;;  %v769_v55 = vld [vmem:[%s2200_s12 + $0x340] sm:$0xff] }
 0x1c8   :  { %1247 = vmatprep.subr.bf16.mxu0 %v1246_v1  ;;  %1311 = vmatprep.subr.bf16.mxu1 %v1310_v2  ;;  %v738_v1 = vld [vmem:[%s2200_s12 + $0x248] sm:$0xff]  ;;  %v1348_v54 = vpack.c.bf16 %v767_v48, %v763_v47 }
 0x1c9   :  { %v742_v2 = vld [vmem:[%s2200_s12 + $0x268] sm:$0xff] }
 0x1cb   :  { %1249 = vmatpush1.bf16.msra.mxu0 %v1248_v9  ;;  %1313 = vmatpush1.bf16.msra.mxu1 %v1312_v10  ;;  %v1270_v9 = vpack.c.bf16 %v742_v2, %v738_v1  ;;  %v1334_v10 = vpack.c.bf16 %v744_v4, %v740_v3  ;;  %v780_v1 = vld [vmem:[%s2200_s12 + $0x398] sm:$0xff]  ;;  %v1290_v2 = vpack.c.bf16 %v782_v0, %v778_v63  ;;  %v777_v4 = vld [vmem:[%s2200_s12 + $0x380] sm:$0xff] }
 0x1cc   :  { %1251 = vmatprep.subr.bf16.mxu0 %v1250_v13  ;;  %1315 = vmatprep.subr.bf16.mxu1 %v1314_v14  ;;  %v746_v13 = vld [vmem:[%s2200_s12 + $0x288] sm:$0xff]  ;;  %v784_v3 = vld [vmem:[%s2200_s12 + $0x3b8] sm:$0xff] }
 0x1cd   :  { %v750_v14 = vld [vmem:[%s2200_s12 + $0x2a8] sm:$0xff] }
 0x1cf   :  { %1253 = vmatpush1.bf16.msra.mxu0 %v1252_v21  ;;  %1317 = vmatpush1.bf16.msra.mxu1 %v1316_v22  ;;  %v1274_v21 = vpack.c.bf16 %v750_v14, %v746_v13  ;;  %v1338_v22 = vpack.c.bf16 %v752_v16, %v748_v15  ;;  %v788_v13 = vld [vmem:[%s2200_s12 + $0x3d8] sm:$0xff]  ;;  %v1294_v14 = vpack.c.bf16 %v790_v12, %v786_v11  ;;  %v785_v16 = vld [vmem:[%s2200_s12 + $0x3c0] sm:$0xff] }
 0x1d0   :  { %1255 = vmatprep.subr.bf16.mxu0 %v1254_v25  ;;  %1319 = vmatprep.subr.bf16.mxu1 %v1318_v26  ;;  %v754_v25 = vld [vmem:[%s2200_s12 + $0x2c8] sm:$0xff]  ;;  %v792_v15 = vld [vmem:[%s2200_s12 + $0x3f8] sm:$0xff] }
 0x1d1   :  { %v758_v26 = vld [vmem:[%s2200_s12 + $0x2e8] sm:$0xff] }
 0x1d3   :  { %1257 = vmatpush1.bf16.msra.mxu0 %v1256_v33  ;;  %1321 = vmatpush1.bf16.msra.mxu1 %v1320_v34  ;;  %v1278_v33 = vpack.c.bf16 %v758_v26, %v754_v25  ;;  %v1342_v34 = vpack.c.bf16 %v760_v28, %v756_v27  ;;  %v455_v25 = vsub.s32 0, %v454_v24  ;;  %v451_v26 = vld [vmem:[%s2198_s10] sm:$0x3]  ;;  %v459_v27 = vsub.s32 1, %v454_v24 }
 0x1d4   :  { %1259 = vmatprep.subr.bf16.mxu0 %v1258_v37  ;;  %1323 = vmatprep.subr.bf16.mxu1 %v1322_v38  ;;  %v762_v37 = vld [vmem:[%s2200_s12 + $0x308] sm:$0xff] }
 0x1d5   :  { %v766_v38 = vld [vmem:[%s2200_s12 + $0x328] sm:$0xff]  ;;  %v456_v28 = vrot.slane %v451_v26, %v455_v25 }
 0x1d7   :  { %1261 = vmatpush1.bf16.msra.mxu0 %v1260_v45  ;;  %1325 = vmatpush1.bf16.msra.mxu1 %v1324_v46  ;;  %v1282_v45 = vpack.c.bf16 %v766_v38, %v762_v37  ;;  %v1346_v46 = vpack.c.bf16 %v768_v40, %v764_v39 }
 0x1d8   :  { %1263 = vmatprep.subr.bf16.mxu0 %v1262_v49  ;;  %1327 = vmatprep.subr.bf16.mxu1 %v1326_v50  ;;  %v770_v49 = vld [vmem:[%s2200_s12 + $0x348] sm:$0xff] }
 0x1d9   :  { %v774_v50 = vld [vmem:[%s2200_s12 + $0x368] sm:$0xff] }
 0x1da   :  { %v1286_v56 = vpack.c.bf16 %v774_v50, %v770_v49 }
 0x1db   :  { %1265 = vmatpush1.bf16.msra.mxu0 %v1264_v57  ;;  %1329 = vmatpush1.bf16.msra.mxu1 %v1328_v58  ;;  %v1350_v57 = vpack.c.bf16 %v776_v52, %v772_v51  ;;  %v773_v58 = vld [vmem:[%s2200_s12 + $0x360] sm:$0xff] }
 0x1dc   :  { %1267 = vmatprep.subr.bf16.mxu0 %v1266_v61  ;;  %1331 = vmatprep.subr.bf16.mxu1 %v1330_v62  ;;  %v1288_v61 = vpack.c.bf16 %v773_v58, %v769_v55  ;;  %v1352_v62 = vpack.c.bf16 %v775_v60, %v771_v59  ;;  %v793_v55 = vld [vmem:[%s2201_s13] sm:$0xf]  ;;  %v809_v58 = vsub.s32 3, %v454_v24 }
 0x1dd   :  { %v802_v63 = vrot.slane %v793_v55, %v459_v27 }
 0x1df   :  { %1269 = vmatpush1.bf16.msra.mxu0 %v1268_v5  ;;  %1333 = vmatpush1.bf16.msra.mxu1 %v1332_v6  ;;  %v781_v5 = vld [vmem:[%s2200_s12 + $0x3a0] sm:$0xff]  ;;  %v1354_v6 = vpack.c.bf16 %v784_v3, %v780_v1  ;;  %v810_v1 = vrot.slane %v793_v55, %v809_v58 }
 0x1e0   :  { %1271 = vmatprep.subr.bf16.mxu0 %v1270_v9  ;;  %1335 = vmatprep.subr.bf16.mxu1 %v1334_v10  ;;  %v1292_v7 = vpack.c.bf16 %v781_v5, %v777_v4  ;;  %v783_v9 = vld [vmem:[%s2200_s12 + $0x3b0] sm:$0xff] }
 0x1e1   :  { %v1356_v10 = vpack.c.bf16 %v783_v9, %v779_v8 }
 0x1e3   :  { %1273 = vmatpush1.bf16.msra.mxu0 %v1272_v17  ;;  %1337 = vmatpush1.bf16.msra.mxu1 %v1336_v18  ;;  %v789_v17 = vld [vmem:[%s2200_s12 + $0x3e0] sm:$0xff]  ;;  %v1358_v18 = vpack.c.bf16 %v792_v15, %v788_v13 }
 0x1e4   :  { %1275 = vmatprep.subr.bf16.mxu0 %v1274_v21  ;;  %1339 = vmatprep.subr.bf16.mxu1 %v1338_v22  ;;  %v1296_v19 = vpack.c.bf16 %v789_v17, %v785_v16  ;;  %v791_v21 = vld [vmem:[%s2200_s12 + $0x3f0] sm:$0xff]  ;;  %v969_v13 = vld [vmem:[%s2189_s1] sm:$0xff] }
 0x1e5   :  { %v1360_v22 = vpack.c.bf16 %v791_v21, %v787_v20  ;;  %v1013_v20 = vld [vmem:[%s2190_s2 + $0x8] sm:$0xff]  ;;  %v1014_v21 = vld [vmem:[%s2190_s2 + $0x10] sm:$0xff] }
 0x1e7   :  { %1277 = vmatpush1.bf16.msra.mxu0 %v1276_v29  ;;  %1341 = vmatpush1.bf16.msra.mxu1 %v1340_v30  ;;  %v460_v29 = vrot.slane %v451_v26, %v459_v27 }
 0x1e8   :  { %1279 = vmatprep.subr.bf16.mxu0 %v1278_v33  ;;  %1343 = vmatprep.subr.bf16.mxu1 %v1342_v34 }
 0x1eb   :  { %1281 = vmatpush1.bf16.msra.mxu0 %v1280_v41  ;;  %1345 = vmatpush1.bf16.msra.mxu1 %v1344_v42 }
 0x1ec   :  { %1283 = vmatprep.subr.bf16.mxu0 %v1282_v45  ;;  %1347 = vmatprep.subr.bf16.mxu1 %v1346_v46 }
 0x1ef   :  { %1285 = vmatpush1.bf16.msra.mxu0 %v1284_v53  ;;  %1349 = vmatpush1.bf16.msra.mxu1 %v1348_v54  ;;  %v805_v54 = vsub.s32 2, %v454_v24 }
 0x1f0   :  { %1287 = vmatprep.subr.bf16.mxu0 %v1286_v56  ;;  %1351 = vmatprep.subr.bf16.mxu1 %v1350_v57  ;;  %v798_v56 = vrot.slane %v793_v55, %v455_v25 }
 0x1f1   :  { %v806_v57 = vrot.slane %v793_v55, %v805_v54 }
 0x1f3   :  { %1289 = vmatpush1.bf16.msra.mxu0 %v1288_v61  ;;  %1353 = vmatpush1.bf16.msra.mxu1 %v1352_v62 }
 0x1f4   :  { %1291 = vmatprep.subr.bf16.mxu0 %v1290_v2  ;;  %1355 = vmatprep.subr.bf16.mxu1 %v1354_v6 }
 0x1f7   :  { %1293 = vmatpush1.bf16.msra.mxu0 %v1292_v7  ;;  %1357 = vmatpush1.bf16.msra.mxu1 %v1356_v10 }
 0x1f8   :  { %1295 = vmatprep.subr.bf16.mxu0 %v1294_v14  ;;  %1359 = vmatprep.subr.bf16.mxu1 %v1358_v18  ;;  %v1012_v14 = vld [vmem:[%s2190_s2] sm:$0xff] }
 0x1fb   :  { %1297 = vmatpush1.bf16.msra.mxu0 %v1296_v19  ;;  %1361 = vmatpush1.bf16.msra.mxu1 %v1360_v22  ;;  %v1015_v19 = vld [vmem:[%s2190_s2 + $0x18] sm:$0xff] }
 0x290   :  { %v529_v30 = vpop.f32.mrb[4].mxu0  ;;  %v650_v31 = vpop.f32.mrb[4].mxu1 }
 0x291   :  { %v530_v32 = vadd.f32 %v529_v30, %v456_v28  ;;  %v531_v33 = vpop.f32.mrb[5].mxu0  ;;  %v652_v34 = vpop.f32.mrb[5].mxu1  ;;  %v970_v30 = vld [vmem:[%s2189_s1 + $0x8] sm:$0xff] }
 0x292   :  { %v532_v35 = vadd.f32 %v531_v33, %v460_v29 }
 0x293   :  { %v544_v36 = vmul.f32 0.01, %v530_v32  ;;  %vm540_vm7 = vcmp.ge.f32.partialorder %v530_v32, 0.0 }
 0x294   :  { %v545_v37 = vmul.f32 0.01, %v532_v35  ;;  %vm541_vm8 = vcmp.ge.f32.partialorder %v532_v35, 0.0  ;;  %v535_v38 = vpop.f32.mrb[6].mxu0  ;;  %v656_v39 = vpop.f32.mrb[6].mxu1 }
 0x295   :  { %v548_v40 = vsel %vm540_vm7, %v530_v32, %v544_v36  ;;  %v536_v41 = vadd.f32 %v535_v38, %v456_v28  ;;  %v537_v42 = vpop.f32.mrb[7].mxu0  ;;  %v658_v43 = vpop.f32.mrb[7].mxu1  ;;  %v1017_v32 = vld [vmem:[%s2190_s2 + $0x28] sm:$0xff] }
 0x296   :  { %v661_v44 = vadd.f32 %v650_v31, %v548_v40  ;;  %v549_v45 = vsel %vm541_vm8, %v532_v35, %v545_v37  ;;  %v538_v46 = vadd.f32 %v537_v42, %v460_v29  ;;  %v1016_v31 = vld [vmem:[%s2190_s2 + $0x20] sm:$0xff]  ;;  %v1019_v40 = vld [vmem:[%s2190_s2 + $0x38] sm:$0xff] }
 0x297   :  { %v662_v47 = vadd.f32 %v652_v34, %v549_v45  ;;  %v546_v48 = vmul.f32 0.01, %v536_v41  ;;  %vm542_vm9 = vcmp.ge.f32.partialorder %v536_v41, 0.0 }
 0x298   :  { %v547_v49 = vmul.f32 0.01, %v538_v46  ;;  %vm543_vm10 = vcmp.ge.f32.partialorder %v538_v46, 0.0 }
 0x299   :  { %v550_v50 = vsel %vm542_vm9, %v536_v41, %v546_v48  ;;  %879 = vmatprep.mubr.f32.mxu0 %v662_v47  ;;  %956 = vmatprep.mubr.f32.mxu1 %v662_v47 }
 0x29a   :  { %v663_v51 = vadd.f32 %v656_v39, %v550_v50  ;;  %v551_v52 = vsel %vm543_vm10, %v538_v46, %v547_v49  ;;  %880 = vmatmul.mubr.f32.vlgmr.msra.gmra.mrb[8].mxu0 %v661_v44  ;;  %957 = vmatmul.mubr.f32.vlgmr.msra.gmra.mrb[8].mxu1 %v661_v44  ;;  %v1018_v39 = vld [vmem:[%s2190_s2 + $0x30] sm:$0xff] }
 0x29b   :  { %v664_v53 = vadd.f32 %v658_v43, %v551_v52 }
 0x29d   :  { %885 = vmatprep.mubr.f32.mxu0 %v664_v53  ;;  %962 = vmatprep.mubr.f32.mxu1 %v664_v53 }
 0x29e   :  { %886 = vmatmul.mubr.f32.gmra.mrb[10].mxu0 %v663_v51  ;;  %963 = vmatmul.mubr.f32.gmra.mrb[10].mxu1 %v663_v51 }
 0x36d   :  { %v881_v59 = vpop.f32.mrb[8].mxu0  ;;  %v958_v60 = vpop.f32.mrb[8].mxu1 }
 0x36e   :  { %v882_v61 = vadd.f32 %v881_v59, %v798_v56  ;;  %v959_v62 = vadd.f32 %v958_v60, %v806_v57  ;;  %v883_v0 = vpop.f32.mrb[9].mxu0  ;;  %v960_v2 = vpop.f32.mrb[9].mxu1 }
 0x36f   :  { %v884_v5 = vadd.f32 %v883_v0, %v802_v63  ;;  %v961_v6 = vadd.f32 %v960_v2, %v810_v1 }
 0x370   :  { %983 = vrot.lane.b32.xlu1 %v959_v62, %s1391_s20  ;;  %979 = vrot.lane.b32.xlu0 %v882_v61, %s1391_s20 }
 0x371   :  { %v887_v3 = vpop.f32.mrb[10].mxu0  ;;  %v964_v4 = vpop.f32.mrb[10].mxu1 }
 0x372   :  { %v889_v7 = vpop.f32.mrb[11].mxu0  ;;  %v966_v8 = vpop.f32.mrb[11].mxu1  ;;  %v888_v9 = vadd.f32 %v887_v3, %v798_v56  ;;  %v965_v11 = vadd.f32 %v964_v4, %v806_v57 }
 0x373   :  { %v890_v10 = vadd.f32 %v889_v7, %v802_v63  ;;  %v967_v12 = vadd.f32 %v966_v8, %v810_v1 }
 0x374   :  { %985 = vrot.lane.b32.xlu1 %v961_v6, %s1391_s20  ;;  %981 = vrot.lane.b32.xlu0 %v884_v5, %s1391_s20 }
 0x378   :  { %989 = vrot.lane.b32.xlu1 %v890_v10, %s1391_s20  ;;  %987 = vrot.lane.b32.xlu0 %v888_v9, %s1391_s20 }
 0x37c   :  { %993 = vrot.lane.b32.xlu1 %v967_v12, %s1391_s20  ;;  %991 = vrot.lane.b32.xlu0 %v965_v11, %s1391_s20 }
 0x3e2   :  { %v984_v15 = vpop.permute.xlu1 %983  ;;  %v980_v16 = vpop.permute.xlu0 %979 }
 0x3e3   :  { %v1010_v17 = vsel %vm995_vm11, %v969_v13, %v980_v16 }
 0x3e4   :  { %v1020_v18 = vadd.f32 %v1012_v14, %v1010_v17 }
 0x3e6   :  { %1028 = vst [vmem:[#allocation2] sm:$0xff] %v1020_v18  ;;  %v986_v22 = vpop.permute.xlu1 %985  ;;  %v982_v23 = vpop.permute.xlu0 %981 }
 0x3e7   :  { %v998_v24 = vsel %vm995_vm11, %v984_v15, %v986_v22  ;;  %v996_v25 = vsel %vm995_vm11, %v980_v16, %v982_v23  ;;  %v997_v26 = vsel %vm995_vm11, %v982_v23, %v984_v15 }
 0x3e8   :  { %v1023_v27 = vadd.f32 %v1015_v19, %v998_v24  ;;  %v1021_v28 = vadd.f32 %v1013_v20, %v996_v25  ;;  %v1022_v29 = vadd.f32 %v1014_v21, %v997_v26 }
 0x3ea   :  { %1031 = vst [vmem:[#allocation2 + $0x18] sm:$0xff] %v1023_v27  ;;  %1029 = vst [vmem:[#allocation2 + $0x8] sm:$0xff] %v1021_v28  ;;  %v990_v33 = vpop.permute.xlu1 %989  ;;  %v988_v34 = vpop.permute.xlu0 %987 }
 0x3eb   :  { %1030 = vst [vmem:[#allocation2 + $0x10] sm:$0xff] %v1022_v29  ;;  %v999_v35 = vsel %vm995_vm11, %v988_v34, %v990_v33  ;;  %v1011_v36 = vsel %vm995_vm11, %v970_v30, %v988_v34 }
 0x3ec   :  { %v1024_v37 = vadd.f32 %v1016_v31, %v1011_v36  ;;  %v1025_v38 = vadd.f32 %v1017_v32, %v999_v35 }
 0x3ee   :  { %1032 = vst [vmem:[#allocation2 + $0x20] sm:$0xff] %v1024_v37  ;;  %1033 = vst [vmem:[#allocation2 + $0x28] sm:$0xff] %v1025_v38  ;;  %v994_v41 = vpop.permute.xlu1 %993  ;;  %v992_v42 = vpop.permute.xlu0 %991 }
 0x3ef   :  { %v1000_v43 = vsel %vm995_vm11, %v990_v33, %v992_v42  ;;  %v1001_v44 = vsel %vm995_vm11, %v992_v42, %v994_v41 }
 0x3f0   :  { %v1026_v45 = vadd.f32 %v1018_v39, %v1000_v43  ;;  %v1027_v46 = vadd.f32 %v1019_v40, %v1001_v44 }
 0x3f2   :  { %1034 = vst [vmem:[#allocation2 + $0x30] sm:$0xff] %v1026_v45  ;;  %1035 = vst [vmem:[#allocation2 + $0x38] sm:$0xff] %v1027_v46 }
 0x3f3   :  { %1377 = shalt.err (!%p1374_p4)
}
 0x3f4   :  { %s1378_s18 = scalar_lea.hbm %s2202_s14, 1024 }
 0x3f5   :  { %p1379_p5 = scmp.ne.s32.totalorder %s2202_s14, %s1378_s18  ;;  %p1382_p6 = scmp.lt.u32.totalorder %s1378_s18, %s2202_s14 }
 0x3f7   :  { %p1384_p7 = pnand %p1382_p6, %p1379_p5 }
 0x3f9   :  { %1387 = shalt.err (!%p1384_p7)
}
 0x3fa   :  { %s1393_s8 = smov 512  }
 0x3fb   :  { %1047 = dma.vmem_to_hbm [thread:$0]  %s1042_s6, 1024, %s2202_s14, [#allocation3], %s1393_s8, %s1393_s8, %s1391_s20  }
 0x3fc   :  { %1388 = dma.done.wait [#allocation3], 1024  }
 0x3fd   :  { %1389 = vsyncadd [#allocation3], 4294966272 }
 0x3fe   :  { %1051 = vsyncpa [#allocation3], 1 }

</bundles_post_ra>
